<compile_context>
chip_gen: v7x
topology: tpu7x:2x2x1
jax: 0.10.0
libtpu: 0.0.40
codegen_flags: <defaults>
</compile_context>

<pallas_src>
import functools

import jax
import jax.numpy as jnp
from jax import lax
from jax.experimental import pallas as pl
from jax.experimental.pallas import tpu as pltpu


def _distances(x, p, pn2):
    """d[k, n] = ||x_n - p_k||_2 for one x tile, produced in lane-dense (K, TN) layout."""
    xf = x.astype(jnp.float32)                                           # in-kernel cast (bf16 ok)
    # MXU: s[k, n] = p_k . x_n   (contract C on both operands == p @ x^T, flash-attn style)
    s = lax.dot_general(p, xf, dimension_numbers=(((1,), (1,)), ((), ())),
                        preferred_element_type=jnp.float32)              # (K, TN)
    # MXU: xn2[0, n] = ||x_n||^2  (ones(1,C) @ (x*x)^T) — already lane-oriented.
    ones_c = jnp.ones((1, xf.shape[1]), jnp.float32)
    xn2 = lax.dot_general(ones_c, xf * xf, dimension_numbers=(((1,), (1,)), ((), ())),
                          preferred_element_type=jnp.float32)             # (1, TN)
    d2 = pn2 + xn2 - 2.0 * s                                              # (K, TN)
    # clamp: catastrophic cancellation can leave tiny negatives before sqrt.
    return jnp.sqrt(jnp.maximum(d2, 0.0))


def _proto_kernel_eval(x_ref, p_ref, pn2_ref, sim_ref):
    d = _distances(x_ref[...], p_ref[...], pn2_ref[...])                 # (K, TN)
    sim_ref[...] = jnp.exp(-d)


def _proto_kernel_train(x_ref, p_ref, pn2_ref, sim_ref, cmin_ref, esum_ref,
                        *, n_valid, tn):
    i = pl.program_id(0)
    d = _distances(x_ref[...], p_ref[...], pn2_ref[...])                 # (K, TN)
    sim_ref[...] = jnp.exp(-d)

    # Lane-validity mask for the padded tail tile.
    col = i * tn + lax.broadcasted_iota(jnp.int32, (1, tn), 1)           # (1, TN)
    valid = col < n_valid

    # Per-tile clustering partial: min over valid n of d[k, n], per prototype k.
    d_masked = jnp.where(valid, d, jnp.inf)                              # (K, TN)
    cmin_ref[...] = jnp.min(d_masked, axis=1, keepdims=True)             # (K, 1)

    # Per-tile evidence partial: sum over valid n of min_k d[k, n].
    col_min = jnp.min(d, axis=0, keepdims=True)                          # (1, TN)
    esum_ref[...] = jnp.sum(jnp.where(valid, col_min, 0.0), keepdims=True)  # (1, 1)


def _round_up(a, b):
    return ((a + b - 1) // b) * b


def _choose_tile(n, tn_cap, min_steps=4):
    """Largest 128-multiple tile <= tn_cap that (when N allows) keeps >= min_steps grid steps."""
    n128 = _round_up(max(n, 1), 128)
    per_step = _round_up((n128 + min_steps - 1) // min_steps, 128)
    tn_eff = min(tn_cap, n128, max(per_step, 128))
    return max(_round_up(tn_eff, 128), 128)


def prototype_layer(x, prototypes, *, dmin=1.0, Ld=0.01, Lc=0.01, Le=0.1,
                    training=False, tn=8192, output_layout="nk"):
    """Forward pass of PrototypeLayer (prototype_learning=True).

    x          : (N, C) float32 or bfloat16 feature rows
    prototypes : (1, K, C) float32 parameter
    output_layout: "nk" -> sim is (N, K) (matches the PyTorch module);
                   "kn" -> sim is (K, N) lane-dense (avoids the relayout when the
                           downstream consumer can take it directly).
    returns (exp(-d), protoLoss scalar)
    """
    x = jnp.asarray(x)
    if x.dtype not in (jnp.float32, jnp.bfloat16):
        x = x.astype(jnp.float32)
    N, C = x.shape
    p = jnp.asarray(prototypes).reshape(-1, C).astype(jnp.float32)       # (K, C)
    K = p.shape[0]

    # Tile over N (lane dim of the output). Keep >= 4 grid steps when N allows (v7x megacore
    # + pipeline overlap); pad N up to a multiple of the tile.
    tn_eff = _choose_tile(N, tn)
    n_pad = _round_up(N, tn_eff)
    x_in = jnp.pad(x, ((0, n_pad - N), (0, 0))) if n_pad != N else x
    grid_n = n_pad // tn_eff
    grid = (grid_n,)

    pn2 = jnp.sum(p * p, axis=1, keepdims=True)                          # (K, 1), hoisted

    x_spec = pl.BlockSpec((tn_eff, C), lambda i: (i, 0))
    p_spec = pl.BlockSpec((K, C), lambda i: (0, 0))
    pn2_spec = pl.BlockSpec((K, 1), lambda i: (0, 0))
    sim_spec = pl.BlockSpec((K, tn_eff), lambda i: (0, i))

    # Real VMEM use: x block lane-pads C=32 -> 128; sim block sublane-pads K -> 8.
    x_item = jnp.dtype(x.dtype).itemsize
    vmem_need = (2 * tn_eff * _round_up(C, 128) * x_item            # double-buffered x
                 + 2 * _round_up(K, 8) * tn_eff * 4                 # double-buffered sim
                 + 4 * _round_up(K, 8) * 128 * 4)                   # p, pn2 (tiny)
    cp_kwargs = dict(dimension_semantics=("parallel",))
    if vmem_need > 12 * (1 << 20):   # above v5e's 16 MiB scoped default territory
        cp_kwargs["vmem_limit_bytes"] = min(64 * (1 << 20),
                                            _round_up(2 * vmem_need, 1 << 20))
    compiler_params = pltpu.CompilerParams(**cp_kwargs)

    cost = pl.CostEstimate(
        flops=2 * n_pad * K * C + 2 * n_pad * C + 4 * n_pad * K,
        transcendentals=2 * n_pad * K,                               # sqrt + exp per (k, n)
        bytes_accessed=n_pad * C * x_item + n_pad * K * 4 + K * C * 4)

    if not training:
        sim_t = pl.pallas_call(
            _proto_kernel_eval,
            out_shape=jax.ShapeDtypeStruct((K, n_pad), jnp.float32),
            grid_spec=pltpu.PrefetchScalarGridSpec(
                num_scalar_prefetch=0, grid=grid,
                in_specs=[x_spec, p_spec, pn2_spec],
                out_specs=sim_spec),
            compiler_params=compiler_params,
            cost_estimate=cost,
        )(x_in, p, pn2)
        sim_kn = sim_t[:, :N]
        sim = sim_kn.T if output_layout == "nk" else sim_kn
        return sim, jnp.float32(0.0)

    kernel = functools.partial(_proto_kernel_train, n_valid=N, tn=tn_eff)
    sim_t, cmin_part, esum_part = pl.pallas_call(
        kernel,
        out_shape=(jax.ShapeDtypeStruct((K, n_pad), jnp.float32),
                   jax.ShapeDtypeStruct((grid_n, K, 1), jnp.float32),
                   jax.ShapeDtypeStruct((grid_n, 1, 1), jnp.float32)),
        grid_spec=pltpu.PrefetchScalarGridSpec(
            num_scalar_prefetch=0, grid=grid,
            in_specs=[x_spec, p_spec, pn2_spec],
            out_specs=[sim_spec,
                       pl.BlockSpec((None, K, 1), lambda i: (i, 0, 0)),
                       pl.BlockSpec((None, 1, 1), lambda i: (i, 0, 0))]),
        compiler_params=compiler_params,   # per-tile partials -> grid axis is "parallel"
        cost_estimate=cost,
    )(x_in, p, pn2)
    sim_kn = sim_t[:, :N]
    sim = sim_kn.T if output_layout == "nk" else sim_kn

    # Tiny wrapper reductions over the per-tile partials (a few hundred bytes of HBM).
    cmin = jnp.min(cmin_part[:, :, 0], axis=0)                           # (K,)
    esum = jnp.sum(esum_part)

    # Diversity term: tiny K x K distance matrix, plain-JAX glue (matches _diversity_term).
    rA = jnp.sum(p * p, axis=-1, keepdims=True)                          # (K, 1)
    D = rA - 2.0 * (p @ p.T) + rA.T                                      # (K, K)
    zero_diag = 1.0 - jnp.eye(K, dtype=D.dtype)
    D = jnp.sqrt(jnp.abs(D * zero_diag))
    Rd = jax.nn.relu(-D + dmin)
    d_loss = Ld * (jnp.sum(jnp.square(Rd * zero_diag)) / 2.0)
    c_loss = Lc * jnp.sum(cmin)                                          # clustering
    e_loss = Le * esum                                                   # evidence
    return sim, d_loss + c_loss + e_loss


def _reference(x, prototypes, *, dmin=1.0, Ld=0.01, Lc=0.01, Le=0.1, training=False):
    """Pure-JAX reference matching the PyTorch forward (train and eval)."""
    x = x.astype(jnp.float32)
    p = prototypes.reshape(-1, x.shape[-1]).astype(jnp.float32)
    d = jnp.linalg.norm(x[:, None, :] - p[None, :, :], axis=-1)          # (N, K)
    sim = jnp.exp(-d)
    if not training:
        return sim, jnp.float32(0.0)
    K = p.shape[0]
    rA = jnp.sum(p * p, axis=-1, keepdims=True)
    D = rA - 2.0 * (p @ p.T) + rA.T
    zd = 1.0 - jnp.eye(K, dtype=D.dtype)
    D = jnp.sqrt(jnp.abs(D * zd))
    Rd = jax.nn.relu(-D + dmin)
    d_loss = Ld * (jnp.sum(jnp.square(Rd * zd)) / 2.0)
    c_loss = Lc * jnp.sum(jnp.min(d, axis=0))
    e_loss = Le * jnp.sum(jnp.min(d, axis=1))
    return sim, d_loss + c_loss + e_loss


if __name__ == "__main__":
    key = jax.random.PRNGKey(0)
    kx, kp, kx2 = jax.random.split(key, 3)

    # Small shapes: N = batch*time = 16 feature vectors, C = prototype_channels = 32,
    # K = params.k = 8 prototypes.
    N, C, K = 16, 32, 8

    x = jax.random.normal(kx, (N, C), dtype=jnp.float32)

    # Deterministic xavier_uniform-style init for the (1, K, C) prototype parameter.
    fan_in, fan_out = C, K
    bound = (6.0 / (fan_in + fan_out)) ** 0.5
    prototypes = jax.random.uniform(kp, (1, K, C), dtype=jnp.float32,
                                    minval=-bound, maxval=bound)

    # --- Eval-mode forward (default (N, K) layout). ---
    sim, proto_loss = prototype_layer(x, prototypes, training=False)
    sim, proto_loss = jax.block_until_ready((sim, proto_loss))
    ref_sim, _ = _reference(x, prototypes, training=False)
    assert sim.shape == (N, K)
    assert jnp.allclose(sim, ref_sim, atol=1e-4, rtol=2e-2)
    assert float(proto_loss) == 0.0

    # Eval-mode forward with lane-dense (K, N) output (no wrapper relayout).
    sim_kn, _ = prototype_layer(x, prototypes, training=False, output_layout="kn")
    sim_kn = jax.block_until_ready(sim_kn)
    assert sim_kn.shape == (K, N)
    assert jnp.allclose(sim_kn.T, ref_sim, atol=1e-4, rtol=2e-2)

    # --- Training-mode forward (per-tile partial reductions + diversity glue). ---
    sim_t, loss_t = prototype_layer(x, prototypes, training=True)
    sim_t, loss_t = jax.block_until_ready((sim_t, loss_t))
    ref_sim_t, ref_loss_t = _reference(x, prototypes, training=True)
    assert jnp.allclose(sim_t, ref_sim_t, atol=1e-4, rtol=2e-2)
    assert jnp.allclose(loss_t, ref_loss_t, atol=1e-2, rtol=5e-2)

    # --- Larger, non-multiple N: exercises multi-tile grid + padded-tail masking. ---
    N2 = 1000
    x2 = jax.random.normal(kx2, (N2, C), dtype=jnp.float32)
    sim2, loss2 = prototype_layer(x2, prototypes, training=True)
    sim2, loss2 = jax.block_until_ready((sim2, loss2))
    ref_sim2, ref_loss2 = _reference(x2, prototypes, training=True)
    assert sim2.shape == (N2, K)
    assert jnp.allclose(sim2, ref_sim2, atol=1e-4, rtol=2e-2)
    assert jnp.allclose(loss2, ref_loss2, atol=1e-2, rtol=5e-2)

    # bf16 streaming of x (dominant HBM stream) — cast happens inside the kernel.
    sim_bf, loss_bf = prototype_layer(x2.astype(jnp.bfloat16), prototypes, training=True)
    sim_bf, loss_bf = jax.block_until_ready((sim_bf, loss_bf))
    assert jnp.allclose(sim_bf, ref_sim2, atol=3e-2, rtol=5e-2)
    assert jnp.allclose(loss_bf, ref_loss2, atol=0.3, rtol=0.1)

    print("KERNEL_OK")
</pallas_src>

<mosaic_0001>
module attributes {stable_mosaic.version = 11 : i64} {
  func.func @_proto_kernel_eval(%arg0: i32, %arg1: memref<128x32xf32, #tpu.memory_space<vmem>>, %arg2: memref<8x32xf32, #tpu.memory_space<vmem>>, %arg3: memref<8x1xf32, #tpu.memory_space<vmem>>, %arg4: memref<8x128xf32, #tpu.memory_space<vmem>>) attributes {dimension_semantics = [#tpu.dimension_semantics<parallel>], iteration_bounds = array<i64: 1>, scalar_prefetch = 0 : i64, scratch_operands = 0 : i64, tpu.core_type = #tpu.core_type<tc>, window_params = [{transform_indices = @transform_0, window_bounds = array<i64: 128, 32>}, {pipeline_mode = #tpu.pipeline_mode<synchronous>, transform_indices = @transform_1, window_bounds = array<i64: 8, 32>}, {pipeline_mode = #tpu.pipeline_mode<synchronous>, transform_indices = @transform_2, window_bounds = array<i64: 8, 1>}, {transform_indices = @transform_3, window_bounds = array<i64: 8, 128>}]} {
    %c0 = arith.constant 0 : index
    %c0_0 = arith.constant 0 : index
    %0 = vector.load %arg1[%c0, %c0_0] : memref<128x32xf32, #tpu.memory_space<vmem>>, vector<128x32xf32>
    %c0_1 = arith.constant 0 : index
    %c0_2 = arith.constant 0 : index
    %1 = vector.load %arg2[%c0_1, %c0_2] : memref<8x32xf32, #tpu.memory_space<vmem>>, vector<8x32xf32>
    %c0_3 = arith.constant 0 : index
    %c0_4 = arith.constant 0 : index
    %2 = vector.load %arg3[%c0_3, %c0_4] : memref<8x1xf32, #tpu.memory_space<vmem>>, vector<8x1xf32>
    %cst = arith.constant dense<0.000000e+00> : vector<8x128xf32>
    %3 = tpu.matmul %1, %0, %cst {dimension_numbers = #tpu.dot_dimension_numbers<[1], [1], [0], [0], [0, 0, 1, 0], [], []>} : vector<8x32xf32>, vector<128x32xf32>, vector<8x128xf32> -> vector<8x128xf32>
    %cst_5 = arith.constant 1.000000e+00 : f32
    %4 = vector.broadcast %cst_5 : f32 to vector<1x32xf32>
    %5 = arith.mulf %0, %0 : vector<128x32xf32>
    %cst_6 = arith.constant dense<0.000000e+00> : vector<1x128xf32>
    %6 = tpu.matmul %4, %5, %cst_6 {dimension_numbers = #tpu.dot_dimension_numbers<[1], [1], [0], [0], [0, 0, 1, 0], [], []>} : vector<1x32xf32>, vector<128x32xf32>, vector<1x128xf32> -> vector<1x128xf32>
    %7 = vector.broadcast %2 : vector<8x1xf32> to vector<8x128xf32>
    %8 = vector.broadcast %6 : vector<1x128xf32> to vector<8x128xf32>
    %9 = arith.addf %7, %8 : vector<8x128xf32>
    %cst_7 = arith.constant 2.000000e+00 : f32
    %10 = vector.broadcast %cst_7 : f32 to vector<8x128xf32>
    %11 = arith.mulf %10, %3 : vector<8x128xf32>
    %12 = arith.subf %9, %11 : vector<8x128xf32>
    %cst_8 = arith.constant 0.000000e+00 : f32
    %13 = vector.broadcast %cst_8 : f32 to vector<8x128xf32>
    %14 = arith.maximumf %12, %13 : vector<8x128xf32>
    %15 = math.sqrt %14 : vector<8x128xf32>
    %cst_9 = arith.constant 0.000000e+00 : f32
    %16 = vector.broadcast %cst_9 : f32 to vector<8x128xf32>
    %17 = arith.subf %16, %15 : vector<8x128xf32>
    %18 = math.exp %17 : vector<8x128xf32>
    %c0_10 = arith.constant 0 : index
    %c0_11 = arith.constant 0 : index
    %19 = vector.load %arg4[%c0_10, %c0_11] : memref<8x128xf32, #tpu.memory_space<vmem>>, vector<8x128xf32>
    tpu.vector_store %arg4[%c0_10, %c0_11], %18 {strides = array<i32>} : memref<8x128xf32, #tpu.memory_space<vmem>>, vector<8x128xf32>,
    return
  }
  func.func @transform_0(%arg0: i32) -> (i32, i32) {
    %c0_i32 = arith.constant 0 : i32
    %c0_i32_0 = arith.constant 0 : i32
    return %arg0, %c0_i32 : i32, i32
  }
  func.func @transform_1(%arg0: i32) -> (i32, i32) {
    %c0_i32 = arith.constant 0 : i32
    %c0_i32_0 = arith.constant 0 : i32
    %c0_i32_1 = arith.constant 0 : i32
    return %c0_i32, %c0_i32_0 : i32, i32
  }
  func.func @transform_2(%arg0: i32) -> (i32, i32) {
    %c0_i32 = arith.constant 0 : i32
    %c0_i32_0 = arith.constant 0 : i32
    %c0_i32_1 = arith.constant 0 : i32
    return %c0_i32, %c0_i32_0 : i32, i32
  }
  func.func @transform_3(%arg0: i32) -> (i32, i32) {
    %c0_i32 = arith.constant 0 : i32
    %c0_i32_0 = arith.constant 0 : i32
    return %c0_i32, %arg0 : i32, i32
  }
}

</mosaic_0001>

<bundles_post_ra>
// kernel: tpu_custom_call.1
= control target key start
LH: loop header
LB: loop body
LE: loop exit
PB: predicated region body
PF: predicated region fallthrough
CT: control target
= control target key end

     0   :  { %vm33_vm0 = vcmask 261120   ;;  %v567_v2 = vmov 0.0|0.0   ;;  %vm568_vm2 = vmmov 0   ;;  %v569_v9 = vmov 0.0   ;;  %s715_s0 = inlined_call_operand.vmem [shape: f32[128,32], index: 0, kind: input, shape index: {}]   ;;  %s716_s1 = inlined_call_operand.vmem [shape: f32[8,32], index: 1, kind: input, shape index: {}]   ;;  %s717_s2 = inlined_call_operand.vmem [shape: f32[8,1], index: 2, kind: input, shape index: {}]   ;;  %s718_s3 = inlined_call_operand.hbm [shape: f32[8,128], index: 3, kind: output, shape index: {}]  }
   0x1   :  { %v15_v0 = vld [vmem:[%s715_s0] sm:$0xff]  ;;  %v16_v1 = vld [vmem:[%s715_s0 + $0x8] sm:$0xff]  ;;  %500 = vmatprep.subr.bf16.mxu1 %v567_v2  ;;  %468 = vmatprep.subr.bf16.mxu0 %v567_v2  ;;  %vm603_vm1 = vmpackc.low %vm33_vm0, %vm33_vm0 }
   0x2   :  { %v155_v4 = vmul.f32 %v15_v0, %v15_v0  ;;  %v156_v5 = vmul.f32 %v16_v1, %v16_v1  ;;  %v469_v6 = vpack.c.bf16 %v16_v1, %v15_v0  ;;  %v17_v7 = vld [vmem:[%s715_s0 + $0x10] sm:$0xff]  ;;  %v18_v8 = vld [vmem:[%s715_s0 + $0x18] sm:$0xff]  ;;  %465 = vmatprep.mubr.msk.f32.mxu1 %vm568_vm2, %v569_v9 }
   0x3   :  { %v157_v11 = vmul.f32 %v17_v7, %v17_v7  ;;  %v158_v12 = vmul.f32 %v18_v8, %v18_v8 }
   0x4   :  { %v501_v10 = vpack.c.bf16 %v156_v5, %v155_v4  ;;  %471 = vmatpush3.bf16.xpose.msk.msra.mxu0 %vm603_vm1, %v469_v6 }
   0x5   :  { %472 = vmatprep.subr.bf16.mxu0 %v567_v2 }
   0x6   :  { %503 = vmatpush3.bf16.xpose.msk.msra.mxu1 %vm603_vm1, %v501_v10 }
   0x7   :  { %504 = vmatprep.subr.bf16.mxu1 %v567_v2 }
   0x8   :  { %8 = vsyncpa [#allocation3], 0  ;;  %v473_v13 = vpack.c.bf16 %v18_v8, %v17_v7  ;;  %430 = vmatprep.mubr.msk.f32.mxu0 %vm568_vm2, %v569_v9  ;;  %v32_v14 = vld [vmem:[%s717_s2] sm:$0xff]  ;;  %v505_v15 = vpack.c.bf16 %v158_v12, %v157_v11  ;;  %v20_v17 = vld [vmem:[%s715_s0 + $0x28] sm:$0xff]  ;;  %v570_v18 = vmov 0   ;;  %v571_v54 = vmov 1.0  }
   0x9   :  { %v19_v16 = vld [vmem:[%s715_s0 + $0x20] sm:$0xff]  ;;  %538 = vset.pattern.permute.xlu0 %v570_v18  ;;  %v160_v20 = vmul.f32 %v20_v17, %v20_v17  ;;  %v21_v23 = vld [vmem:[%s715_s0 + $0x30] sm:$0xff]  ;;  %v22_v24 = vld [vmem:[%s715_s0 + $0x38] sm:$0xff]  ;;  %v297_v55 = vlaneseq }
   0xa   :  { %294 = vperm.xlu0 %538, %v32_v14   ;;  %v159_v19 = vmul.f32 %v19_v16, %v19_v16  ;;  %v477_v21 = vpack.c.bf16 %v20_v17, %v19_v16  ;;  %v161_v25 = vmul.f32 %v21_v23, %v21_v23  ;;  %v162_v26 = vmul.f32 %v22_v24, %v22_v24  ;;  %v23_v29 = vld [vmem:[%s715_s0 + $0x40] sm:$0xff]  ;;  %v24_v30 = vld [vmem:[%s715_s0 + $0x48] sm:$0xff]  ;;  %v25_v35 = vld [vmem:[%s715_s0 + $0x50] sm:$0xff] }
   0xb   :  { %v481_v27 = vpack.c.bf16 %v22_v24, %v21_v23  ;;  %v163_v31 = vmul.f32 %v23_v29, %v23_v29  ;;  %v164_v32 = vmul.f32 %v24_v30, %v24_v30  ;;  %v485_v33 = vpack.c.bf16 %v24_v30, %v23_v29  ;;  %v26_v36 = vld [vmem:[%s715_s0 + $0x58] sm:$0xff]  ;;  %v27_v41 = vld [vmem:[%s715_s0 + $0x60] sm:$0xff]  ;;  %v28_v42 = vld [vmem:[%s715_s0 + $0x68] sm:$0xff] }
   0xc   :  { %475 = vmatpush3.bf16.xpose.msk.msra.mxu0 %vm603_vm1, %v473_v13  ;;  %v509_v22 = vpack.c.bf16 %v160_v20, %v159_v19  ;;  %v513_v28 = vpack.c.bf16 %v162_v26, %v161_v25  ;;  %v165_v37 = vmul.f32 %v25_v35, %v25_v35  ;;  %v166_v38 = vmul.f32 %v26_v36, %v26_v36  ;;  %v29_v47 = vld [vmem:[%s715_s0 + $0x70] sm:$0xff]  ;;  %v30_v48 = vld [vmem:[%s715_s0 + $0x78] sm:$0xff]  ;;  %v31_v53 = vld [vmem:[%s716_s1] sm:$0xff]  ;;  %s572_s1 = smov [#allocation2]  }
   0xd   :  { %476 = vmatprep.subr.bf16.mxu0 %v567_v2  ;;  %v517_v34 = vpack.c.bf16 %v164_v32, %v163_v31  ;;  %v489_v39 = vpack.c.bf16 %v26_v36, %v25_v35  ;;  %v167_v43 = vmul.f32 %v27_v41, %v27_v41  ;;  %v168_v44 = vmul.f32 %v28_v42, %v28_v42  ;;  %s322_s19 = sshll.u32 %s572_s1, 4  ;;  %s323_s19 = int_to_ptr.vmem [resolvable:$true] %s322_s19 }
   0xe   :  { %507 = vmatpush3.bf16.xpose.msk.msra.mxu1 %vm603_vm1, %v505_v15  ;;  %v521_v40 = vpack.c.bf16 %v166_v38, %v165_v37  ;;  %v493_v45 = vpack.c.bf16 %v28_v42, %v27_v41  ;;  %v169_v49 = vmul.f32 %v29_v47, %v29_v47  ;;  %v170_v50 = vmul.f32 %v30_v48, %v30_v48  ;;  %s543_s20 = scalar_lea.vmem %s323_s19, 128  ;;  %p548_p1 = scmp.lt.s32.totalorder %s323_s19, %s323_s19 }
   0xf   :  { %508 = vmatprep.subr.bf16.mxu1 %v567_v2  ;;  %v525_v46 = vpack.c.bf16 %v168_v44, %v167_v43  ;;  %v497_v51 = vpack.c.bf16 %v30_v48, %v29_v47  ;;  %v298_v56 = vshrl.u32 %v297_v55, 7  ;;  %p544_p0 = scmp.ne.s32.totalorder %s323_s19, %s543_s20  ;;  %p549_p2 = scmp.lt.s32.totalorder %s543_s20, %s543_s20 }
  0x10   :  { %v529_v52 = vpack.c.bf16 %v170_v50, %v169_v49 }
  0x11   :  { %v299_v57 = vsub.s32 0, %v298_v56  ;;  %p550_p3 = por %p549_p2, %p548_p1 }
  0x13   :  { %p551_p4 = pnand %p550_p3, %p544_p0 }
  0x14   :  { %479 = vmatpush3.bf16.xpose.msk.msra.mxu0 %vm603_vm1, %v477_v21 }
  0x15   :  { %480 = vmatprep.subr.bf16.mxu0 %v567_v2 }
  0x16   :  { %511 = vmatpush3.bf16.xpose.msk.msra.mxu1 %vm603_vm1, %v509_v22 }
  0x17   :  { %512 = vmatprep.subr.bf16.mxu1 %v567_v2 }
  0x1c   :  { %483 = vmatpush3.bf16.xpose.msk.msra.mxu0 %vm603_vm1, %v481_v27 }
  0x1d   :  { %484 = vmatprep.subr.bf16.mxu0 %v567_v2 }
  0x1e   :  { %515 = vmatpush3.bf16.xpose.msk.msra.mxu1 %vm603_vm1, %v513_v28 }
  0x1f   :  { %516 = vmatprep.subr.bf16.mxu1 %v567_v2 }
  0x24   :  { %487 = vmatpush3.bf16.xpose.msk.msra.mxu0 %vm603_vm1, %v485_v33 }
  0x25   :  { %488 = vmatprep.subr.bf16.mxu0 %v567_v2 }
  0x26   :  { %519 = vmatpush3.bf16.xpose.msk.msra.mxu1 %vm603_vm1, %v517_v34 }
  0x27   :  { %520 = vmatprep.subr.bf16.mxu1 %v567_v2 }
  0x2c   :  { %491 = vmatpush3.bf16.xpose.msk.msra.mxu0 %vm603_vm1, %v489_v39 }
  0x2d   :  { %492 = vmatprep.subr.bf16.mxu0 %v567_v2 }
  0x2e   :  { %523 = vmatpush3.bf16.xpose.msk.msra.mxu1 %vm603_vm1, %v521_v40 }
  0x2f   :  { %524 = vmatprep.subr.bf16.mxu1 %v567_v2 }
  0x34   :  { %495 = vmatpush3.bf16.xpose.msk.msra.mxu0 %vm603_vm1, %v493_v45 }
  0x35   :  { %496 = vmatprep.subr.bf16.mxu0 %v567_v2 }
  0x36   :  { %527 = vmatpush3.bf16.xpose.msk.msra.mxu1 %vm603_vm1, %v525_v46 }
  0x37   :  { %528 = vmatprep.subr.bf16.mxu1 %v567_v2 }
  0x3c   :  { %499 = vmatpush3.bf16.xpose.msk.msra.mxu0 %vm603_vm1, %v497_v51 }
  0x3e   :  { %531 = vmatpush3.bf16.xpose.msk.msra.mxu1 %vm603_vm1, %v529_v52 }
  0x43   :  { %431 = vmatmul.mubr.msk.f32.vlgmr.msra.gmra.mrb[0].mxu0 %vm33_vm0, %v31_v53 }
  0x45   :  { %466 = vmatmul.mubr.msk.f32.vlgmr.msra.gmra.mrb[0].mxu1 %vm33_vm0, %v571_v54 }
  0x89   :  { %v295_v61 = vpop.permute.xlu0 %294 }
 0x116   :  { %v151_v58 = vpop.f32.mrb[0].mxu0 }
 0x117   :  { %v432_v59 = vpop.f32.mrb[1].mxu0  ;;  %v302_v63 = vmul.f32 2.0, %v151_v58 }
 0x118   :  { %v288_v60 = vpop.f32.mrb[0].mxu1 }
 0x119   :  { %v300_v62 = vrot.slane %v288_v60, %v299_v57  ;;  %v467_v0 = vpop.f32.mrb[1].mxu1 }
 0x11b   :  { %v301_v1 = vadd.f32 %v300_v62, %v295_v61 }
 0x11d   :  { %v303_v2 = vsub.f32 %v301_v1, %v302_v63 }
 0x11f   :  { %v304_v3 = vmax.f32 %v303_v2, 0.0 }
 0x121   :  { %539 = vrsqrt.f32 %v304_v3  ;;  %vm307_vm3 = vcmp.eq.f32.partialorder %v304_v3, inf  ;;  %v310_v6 = vand.u32 2147483648, %v304_v3  ;;  %vm309_vm4 = vcmp.eq.f32.partialorder %v304_v3, 0.0 }
 0x12b   :  { %v540_v4 = vpop.eup %539 }
 0x12c   :  { %v306_v5 = vmul.f32 %v540_v4, %v304_v3 }
 0x12e   :  { %v308_v7 = vsel %vm307_vm3, %v304_v3, %v306_v5 }
 0x12f   :  { %v311_v8 = vsel %vm309_vm4, %v310_v6, %v308_v7 }
 0x130   :  { %v312_v9 = vsub.f32 0.0, %v311_v8 }
 0x132   :  { %v313_v10 = vmul.f32 1.442695, %v312_v9 }
 0x134   :  { %541 = vpow2.f32 %v313_v10 }
 0x13e   :  { %v542_v11 = vpop.eup %541 }
 0x13f   :  { %315 = vst [vmem:[#allocation2] sm:$0xff] %v542_v11 }
 0x140   :  { %554 = shalt.err (!%p551_p4)
}
 0x141   :  { %s555_s23 = scalar_lea.hbm %s718_s3, 128 }
 0x142   :  { %p556_p5 = scmp.ne.s32.totalorder %s718_s3, %s555_s23  ;;  %p559_p6 = scmp.lt.u32.totalorder %s555_s23, %s718_s3 }
 0x144   :  { %p561_p7 = pnand %p559_p6, %p556_p5 }
 0x146   :  { %564 = shalt.err (!%p561_p7)
}
 0x147   :  { %325 = dma.vmem_to_hbm [thread:$0]  %s323_s19, 128, %s718_s3, [#allocation3]  }
 0x148   :  { %565 = dma.done.wait [#allocation3], 128  }
 0x149   :  { %566 = vsyncadd [#allocation3], 4294967168 }
 0x14a   :  { %329 = vsyncpa [#allocation3], 1 }

</bundles_post_ra>
